<compile_context>
chip_gen: v7x
topology: tpu7x:2x2x1
jax: 0.10.0
libtpu: 0.0.40
codegen_flags: <defaults>
</compile_context>

<pallas_src>
import functools

import jax
import jax.numpy as jnp
from jax import lax
from jax.experimental import pallas as pl
from jax.experimental.pallas import tpu as pltpu


def _round_up(x, m):
    return ((x + m - 1) // m) * m


def _smooth_l1(d):
    ad = jnp.abs(d)
    return jnp.where(ad < 1.0, 0.5 * d * d, ad - 0.5)


def _focal_ssd_kernel(confs_ref, labels_ref, bbox_ref, gtbox_ref, anch_ref,
                      out_ref, cls_acc, reg_acc, pos_acc, *,
                      alpha, gamma, scale_xy, scale_wh):
    i = pl.program_id(1)           # anchor-tile axis ("arbitrary", reduction)

    @pl.when(i == 0)
    def _init():
        cls_acc[...] = jnp.zeros_like(cls_acc)
        reg_acc[...] = jnp.zeros_like(reg_acc)
        pos_acc[...] = jnp.zeros_like(pos_acc)

    confs = confs_ref[...].astype(jnp.float32)     # (B, C, TA)
    labels = labels_ref[...]                       # (B, TA) int32
    B, C, TA = confs.shape

    # ---- focal classification loss: gather the target class first ----
    m = jnp.max(confs, axis=1, keepdims=True)      # (B, 1, TA)
    z = confs - m
    e = jnp.exp(z)                                 # C exps
    lse = jnp.log(jnp.sum(e, axis=1))              # (B, TA)
    cls_idx = lax.broadcasted_iota(jnp.int32, (B, C, TA), 1)
    is_tgt = cls_idx == labels[:, None, :]         # one-hot mask of the label
    z_t = jnp.sum(jnp.where(is_tgt, z, 0.0), axis=1)   # (B, TA)
    log_p_t = z_t - lse                            # log softmax at the label
    p_t = jnp.exp(log_p_t)                         # 1 exp
    w = 1.0 - p_t
    if gamma == 2:
        weight = w * w
    elif float(gamma).is_integer():
        weight = lax.integer_pow(w, int(gamma))
    else:
        weight = w ** gamma
    # alpha[label] via a short select chain on compile-time constants
    # (padded anchors carry label == -1 -> alpha_t == 0 -> zero contribution).
    alpha_t = jnp.zeros_like(log_p_t)
    for c, a in enumerate(alpha):
        alpha_t = jnp.where(labels == c, jnp.float32(a), alpha_t)
    focal_t = -(alpha_t * weight) * log_p_t        # (B, TA)

    # ---- smooth-L1 regression loss, masked sum over positive anchors ----
    bbox = bbox_ref[...].astype(jnp.float32)       # (B, 4, TA)
    gtbox = gtbox_ref[...].astype(jnp.float32)     # (B, 4, TA)
    anch = anch_ref[...].astype(jnp.float32)       # (1, 4, TA)
    pos = labels > 0                               # (B, TA)

    a_xy = anch[:, :2, :]
    a_wh = anch[:, 2:, :]
    t_xy = scale_xy * (gtbox[:, :2, :] - a_xy) / a_wh
    # clamp the ratio for non-positive (and padded) anchors before the log
    ratio = jnp.where(pos[:, None, :], gtbox[:, 2:, :] / a_wh, 1.0)
    t_wh = scale_wh * jnp.log(ratio)
    d_xy = bbox[:, :2, :] - t_xy
    d_wh = bbox[:, 2:, :] - t_wh
    reg = jnp.sum(_smooth_l1(d_xy) + _smooth_l1(d_wh), axis=1)   # (B, TA)

    # elementwise vector accumulation (pure VPU, no per-step XLU reduce)
    cls_acc[...] += focal_t
    reg_acc[...] += jnp.where(pos, reg, 0.0)
    pos_acc[...] += pos.astype(jnp.float32)

    # ---- final reduce + single lane-dense store, once per core ----
    @pl.when(i == pl.num_programs(1) - 1)
    def _flush():
        cls_s = jnp.sum(cls_acc[...])
        reg_s = jnp.sum(reg_acc[...])
        pos_s = jnp.sum(pos_acc[...])
        sub = lax.broadcasted_iota(jnp.int32, (8, 128), 0)
        lane = lax.broadcasted_iota(jnp.int32, (8, 128), 1)
        row0 = sub == 0
        out_ref[...] = jnp.where(row0 & (lane == 0), cls_s,
                       jnp.where(row0 & (lane == 1), reg_s,
                       jnp.where(row0 & (lane == 2), pos_s, 0.0)))


class FocalLossPallas:
    """JAX/Pallas equivalent of the PyTorch FocalLoss module (forward only)."""

    def __init__(self, anchors_xywh, alpha, scale_xy, scale_wh, gamma=2,
                 eps=1e-07, tile_anchors=2048):
        # matches: self.anchors = anchors(order='xywh').transpose(0,1).unsqueeze(0)
        self.anchors = jnp.transpose(jnp.asarray(anchors_xywh, jnp.float32),
                                     (1, 0))[None]               # [1, 4, NA]
        self.alpha = tuple(float(a) for a in alpha)              # static (C,)
        self.scale_xy = 1.0 / scale_xy                           # 1.0 / anchors.scale_xy
        self.scale_wh = 1.0 / scale_wh                           # 1.0 / anchors.scale_wh
        self.gamma = gamma
        self.eps = eps   # kept for API parity; unused in the PyTorch forward too
        self.ta_cap = tile_anchors

    def __call__(self, bbox_delta, confs, gt_bbox, gt_labels):
        B, C, NA = confs.shape
        assert len(self.alpha) == C

        # anchor tiling: big lane-dense tiles, pad NA up to a tile multiple
        ta = min(self.ta_cap, _round_up(NA, 128))
        na_pad = _round_up(NA, ta)
        steps = na_pad // ta
        # leading "parallel" axis lets v7x split anchors across its 2 TCs;
        # degenerates to 1 on single-TC chips / single-step grids.
        ncores = 2 if (steps % 2 == 0 and steps >= 2) else 1
        spc = steps // ncores

        # TODO(synk): gt_bbox ideally arrives anchor-last from upstream; this
        # transpose is the one remaining standalone HBM round trip.
        gt_bbox_t = jnp.transpose(gt_bbox, (0, 2, 1))            # [B, 4, NA]
        labels = gt_labels.astype(jnp.int32)
        anchors = self.anchors

        pad = na_pad - NA
        if pad:
            confs = jnp.pad(confs, ((0, 0), (0, 0), (0, pad)))
            bbox_delta = jnp.pad(bbox_delta, ((0, 0), (0, 0), (0, pad)))
            gt_bbox_t = jnp.pad(gt_bbox_t, ((0, 0), (0, 0), (0, pad)))
            labels = jnp.pad(labels, ((0, 0), (0, pad)), constant_values=-1)
            anchors = jnp.pad(anchors, ((0, 0), (0, 0), (0, pad)),
                              constant_values=1.0)

        kernel = functools.partial(_focal_ssd_kernel, alpha=self.alpha,
                                   gamma=self.gamma, scale_xy=self.scale_xy,
                                   scale_wh=self.scale_wh)

        def map3(c, i):
            return (0, 0, c * spc + i)

        def map2(c, i):
            return (0, c * spc + i)

        out = pl.pallas_call(
            kernel,
            out_shape=jax.ShapeDtypeStruct((ncores * 8, 128), jnp.float32),
            grid=(ncores, spc),
            in_specs=[
                pl.BlockSpec((B, C, ta), map3),        # confs
                pl.BlockSpec((B, ta), map2),           # gt_labels
                pl.BlockSpec((B, 4, ta), map3),        # bbox_delta
                pl.BlockSpec((B, 4, ta), map3),        # gt_bbox (anchor-last)
                pl.BlockSpec((1, 4, ta), map3),        # anchors
            ],
            out_specs=pl.BlockSpec((8, 128), lambda c, i: (c, 0)),
            scratch_shapes=[
                pltpu.VMEM((B, ta), jnp.float32),      # cls partial sums
                pltpu.VMEM((B, ta), jnp.float32),      # reg partial sums
                pltpu.VMEM((B, ta), jnp.float32),      # num_pos partial sums
            ],
            compiler_params=pltpu.CompilerParams(
                dimension_semantics=("parallel", "arbitrary")),
        )(confs, labels, bbox_delta, gt_bbox_t, anchors)

        parts = out.reshape(ncores, 8, 128)
        cls_sum = jnp.sum(parts[:, 0, 0])
        reg_sum = jnp.sum(parts[:, 0, 1])
        npos = jnp.sum(parts[:, 0, 2])

        classification_loss = cls_sum / (B * NA)                 # .sum(dim=1).mean()
        num_pos = jnp.maximum(npos, 1.0)                         # guard empty-positive batch
        regression_loss = reg_sum / num_pos
        total_loss = regression_loss + classification_loss
        to_log = dict(regression_loss=regression_loss,
                      classification_loss=classification_loss,
                      total_loss=total_loss)
        return total_loss, to_log


def _reference(bbox_delta, confs, gt_bbox, gt_labels, anchors, alpha,
               scale_xy, scale_wh, gamma):
    """Pure-JAX reference matching the PyTorch forward, for validation."""
    B, C, NA = confs.shape
    gt_bbox = jnp.transpose(gt_bbox, (0, 2, 1))
    log_pk = jax.nn.log_softmax(confs, axis=1)
    p_k = jax.nn.softmax(confs, axis=1)
    hot = jnp.transpose(jax.nn.one_hot(gt_labels, C), (0, 2, 1))
    a = alpha.reshape(1, C, 1)
    focal = -a * (1.0 - p_k) ** gamma * log_pk
    cls = jnp.mean(jnp.sum(hot * focal, axis=1))
    a_xy, a_wh = anchors[:, :2, :], anchors[:, 2:, :]
    t_xy = scale_xy * (gt_bbox[:, :2, :] - a_xy) / a_wh
    t_wh = scale_wh * jnp.log(gt_bbox[:, 2:, :] / a_wh)
    gt_loc = jnp.concatenate([t_xy, t_wh], axis=1)
    d = bbox_delta - gt_loc
    ad = jnp.abs(d)
    sl1 = jnp.where(ad < 1.0, 0.5 * d * d, ad - 0.5)
    pos = gt_labels > 0
    reg = jnp.sum(jnp.where(pos[:, None, :], sl1, 0.0))
    num_pos = jnp.sum(pos).astype(jnp.float32)
    return reg / num_pos + cls


if __name__ == "__main__":
    key = jax.random.PRNGKey(0)
    B, C, NA = 2, 9, 256
    k1, k2, k3, k4, k5, k6 = jax.random.split(key, 6)

    confs = jax.random.normal(k1, (B, C, NA), jnp.float32)
    bbox_delta = 0.1 * jax.random.normal(k2, (B, 4, NA), jnp.float32)
    gt_xy = jax.random.uniform(k3, (B, NA, 2), jnp.float32, 0.1, 0.9)
    gt_wh = jax.random.uniform(jax.random.fold_in(k3, 1), (B, NA, 2),
                               jnp.float32, 0.05, 0.3)
    gt_bbox = jnp.concatenate([gt_xy, gt_wh], axis=-1)           # [B, NA, 4] xywh
    gt_labels = jax.random.randint(k4, (B, NA), 0, C).astype(jnp.int32)

    # deterministic "anchors" parameter (xywh), as the module's nn.Parameter
    anc_xy = jax.random.uniform(k5, (NA, 2), jnp.float32, 0.1, 0.9)
    anc_wh = jax.random.uniform(k6, (NA, 2), jnp.float32, 0.05, 0.3)
    anchors_xywh = jnp.concatenate([anc_xy, anc_wh], axis=-1)    # [NA, 4]

    alpha = [0.01] + [1.0] * (C - 1)                             # 9 class weights
    scale_xy, scale_wh = 0.1, 0.2                                # anchors.scale_xy / scale_wh

    loss_mod = FocalLossPallas(anchors_xywh, alpha, scale_xy, scale_wh, gamma=2)
    total_loss, to_log = loss_mod(bbox_delta, confs, gt_bbox, gt_labels)
    total_loss = jax.block_until_ready(total_loss)

    ref = _reference(bbox_delta, confs, gt_bbox, gt_labels,
                     jnp.transpose(anchors_xywh, (1, 0))[None],
                     jnp.asarray(alpha, jnp.float32),
                     1.0 / scale_xy, 1.0 / scale_wh, 2)
    assert jnp.allclose(total_loss, ref, rtol=1e-4, atol=1e-4), (total_loss, ref)

    print("KERNEL_OK")
</pallas_src>

<mosaic_0001>
module attributes {stable_mosaic.version = 11 : i64} {
  func.func @_focal_ssd_kernel(%arg0: i32, %arg1: i32, %arg2: memref<2x9x256xf32, #tpu.memory_space<vmem>>, %arg3: memref<2x256xi32, #tpu.memory_space<vmem>>, %arg4: memref<2x4x256xf32, #tpu.memory_space<vmem>>, %arg5: memref<2x4x256xf32, #tpu.memory_space<vmem>>, %arg6: memref<1x4x256xf32, #tpu.memory_space<vmem>>, %arg7: memref<8x128xf32, #tpu.memory_space<vmem>>, %arg8: memref<2x256xf32, #tpu.memory_space<vmem>>, %arg9: memref<2x256xf32, #tpu.memory_space<vmem>>, %arg10: memref<2x256xf32, #tpu.memory_space<vmem>>) attributes {dimension_semantics = [#tpu.dimension_semantics<parallel>, #tpu.dimension_semantics<arbitrary>], iteration_bounds = array<i64: 1, 1>, scalar_prefetch = 0 : i64, scratch_operands = 3 : i64, tpu.core_type = #tpu.core_type<tc>, window_params = [{transform_indices = @transform_0, window_bounds = array<i64: 2, 9, 256>}, {transform_indices = @transform_1, window_bounds = array<i64: 2, 256>}, {transform_indices = @transform_2, window_bounds = array<i64: 2, 4, 256>}, {transform_indices = @transform_3, window_bounds = array<i64: 2, 4, 256>}, {transform_indices = @transform_4, window_bounds = array<i64: 1, 4, 256>}, {transform_indices = @transform_5, window_bounds = array<i64: 8, 128>}]} {
    %c0_i32 = arith.constant 0 : i32
    %0 = arith.cmpi eq, %arg1, %c0_i32 : i32
    %1 = arith.extui %0 : i1 to i32
    %c0_i32_0 = arith.constant 0 : i32
    %2 = arith.cmpi ne, %1, %c0_i32_0 : i32
    scf.if %2 {
      %cst_56 = arith.constant 0.000000e+00 : f32
      %130 = vector.broadcast %cst_56 : f32 to vector<2x256xf32>
      %c0_57 = arith.constant 0 : index
      %c0_58 = arith.constant 0 : index
      %131 = vector.load %arg8[%c0_57, %c0_58] : memref<2x256xf32, #tpu.memory_space<vmem>>, vector<2x256xf32>
      tpu.vector_store %arg8[%c0_57, %c0_58], %130 {strides = array<i32>} : memref<2x256xf32, #tpu.memory_space<vmem>>, vector<2x256xf32>,
      %cst_59 = arith.constant 0.000000e+00 : f32
      %132 = vector.broadcast %cst_59 : f32 to vector<2x256xf32>
      %c0_60 = arith.constant 0 : index
      %c0_61 = arith.constant 0 : index
      %133 = vector.load %arg9[%c0_60, %c0_61] : memref<2x256xf32, #tpu.memory_space<vmem>>, vector<2x256xf32>
      tpu.vector_store %arg9[%c0_60, %c0_61], %132 {strides = array<i32>} : memref<2x256xf32, #tpu.memory_space<vmem>>, vector<2x256xf32>,
      %cst_62 = arith.constant 0.000000e+00 : f32
      %134 = vector.broadcast %cst_62 : f32 to vector<2x256xf32>
      %c0_63 = arith.constant 0 : index
      %c0_64 = arith.constant 0 : index
      %135 = vector.load %arg10[%c0_63, %c0_64] : memref<2x256xf32, #tpu.memory_space<vmem>>, vector<2x256xf32>
      tpu.vector_store %arg10[%c0_63, %c0_64], %134 {strides = array<i32>} : memref<2x256xf32, #tpu.memory_space<vmem>>, vector<2x256xf32>,
    } else {
    }
    %c0 = arith.constant 0 : index
    %c0_1 = arith.constant 0 : index
    %c0_2 = arith.constant 0 : index
    %3 = vector.load %arg2[%c0, %c0_1, %c0_2] : memref<2x9x256xf32, #tpu.memory_space<vmem>>, vector<2x9x256xf32>
    %c0_3 = arith.constant 0 : index
    %c0_4 = arith.constant 0 : index
    %4 = vector.load %arg3[%c0_3, %c0_4] : memref<2x256xi32, #tpu.memory_space<vmem>>, vector<2x256xi32>
    %cst = arith.constant dense<0xFF800000> : vector<2x256xf32>
    %5 = vector.multi_reduction <maximumf>, %3, %cst [1] : vector<2x9x256xf32> to vector<2x256xf32>
    %6 = vector.shape_cast %5 : vector<2x256xf32> to vector<2x1x256xf32>
    %7 = vector.broadcast %6 : vector<2x1x256xf32> to vector<2x9x256xf32>
    %8 = arith.subf %3, %7 : vector<2x9x256xf32>
    %9 = math.exp %8 : vector<2x9x256xf32>
    %cst_5 = arith.constant dense<0.000000e+00> : vector<2x256xf32>
    %10 = vector.multi_reduction <add>, %9, %cst_5 [1] : vector<2x9x256xf32> to vector<2x256xf32>
    %11 = math.log %10 : vector<2x256xf32>
    %12 = tpu.iota {dimensions = array<i32: 1>} : vector<2x9x256xi32>
    %13 = vector.shape_cast %4 : vector<2x256xi32> to vector<2x1x256xi32>
    %14 = vector.broadcast %13 : vector<2x1x256xi32> to vector<2x9x256xi32>
    %15 = arith.cmpi eq, %12, %14 : vector<2x9x256xi32>
    %cst_6 = arith.constant 0.000000e+00 : f32
    %16 = vector.broadcast %cst_6 : f32 to vector<2x9x256xf32>
    %17 = arith.select %15, %8, %16 : vector<2x9x256xi1>, vector<2x9x256xf32>
    %cst_7 = arith.constant dense<0.000000e+00> : vector<2x256xf32>
    %18 = vector.multi_reduction <add>, %17, %cst_7 [1] : vector<2x9x256xf32> to vector<2x256xf32>
    %19 = arith.subf %18, %11 : vector<2x256xf32>
    %20 = math.exp %19 : vector<2x256xf32>
    %cst_8 = arith.constant 1.000000e+00 : f32
    %21 = vector.broadcast %cst_8 : f32 to vector<2x256xf32>
    %22 = arith.subf %21, %20 : vector<2x256xf32>
    %23 = arith.mulf %22, %22 : vector<2x256xf32>
    %cst_9 = arith.constant 0.000000e+00 : f32
    %24 = vector.broadcast %cst_9 : f32 to vector<2x256xf32>
    %c0_i32_10 = arith.constant 0 : i32
    %25 = vector.broadcast %c0_i32_10 : i32 to vector<2x256xi32>
    %26 = arith.cmpi eq, %4, %25 : vector<2x256xi32>
    %cst_11 = arith.constant 0.00999999977 : f32
    %27 = vector.broadcast %cst_11 : f32 to vector<2x256xf32>
    %28 = arith.select %26, %27, %24 : vector<2x256xi1>, vector<2x256xf32>
    %c1_i32 = arith.constant 1 : i32
    %29 = vector.broadcast %c1_i32 : i32 to vector<2x256xi32>
    %30 = arith.cmpi eq, %4, %29 : vector<2x256xi32>
    %cst_12 = arith.constant 1.000000e+00 : f32
    %31 = vector.broadcast %cst_12 : f32 to vector<2x256xf32>
    %32 = arith.select %30, %31, %28 : vector<2x256xi1>, vector<2x256xf32>
    %c2_i32 = arith.constant 2 : i32
    %33 = vector.broadcast %c2_i32 : i32 to vector<2x256xi32>
    %34 = arith.cmpi eq, %4, %33 : vector<2x256xi32>
    %cst_13 = arith.constant 1.000000e+00 : f32
    %35 = vector.broadcast %cst_13 : f32 to vector<2x256xf32>
    %36 = arith.select %34, %35, %32 : vector<2x256xi1>, vector<2x256xf32>
    %c3_i32 = arith.constant 3 : i32
    %37 = vector.broadcast %c3_i32 : i32 to vector<2x256xi32>
    %38 = arith.cmpi eq, %4, %37 : vector<2x256xi32>
    %cst_14 = arith.constant 1.000000e+00 : f32
    %39 = vector.broadcast %cst_14 : f32 to vector<2x256xf32>
    %40 = arith.select %38, %39, %36 : vector<2x256xi1>, vector<2x256xf32>
    %c4_i32 = arith.constant 4 : i32
    %41 = vector.broadcast %c4_i32 : i32 to vector<2x256xi32>
    %42 = arith.cmpi eq, %4, %41 : vector<2x256xi32>
    %cst_15 = arith.constant 1.000000e+00 : f32
    %43 = vector.broadcast %cst_15 : f32 to vector<2x256xf32>
    %44 = arith.select %42, %43, %40 : vector<2x256xi1>, vector<2x256xf32>
    %c5_i32 = arith.constant 5 : i32
    %45 = vector.broadcast %c5_i32 : i32 to vector<2x256xi32>
    %46 = arith.cmpi eq, %4, %45 : vector<2x256xi32>
    %cst_16 = arith.constant 1.000000e+00 : f32
    %47 = vector.broadcast %cst_16 : f32 to vector<2x256xf32>
    %48 = arith.select %46, %47, %44 : vector<2x256xi1>, vector<2x256xf32>
    %c6_i32 = arith.constant 6 : i32
    %49 = vector.broadcast %c6_i32 : i32 to vector<2x256xi32>
    %50 = arith.cmpi eq, %4, %49 : vector<2x256xi32>
    %cst_17 = arith.constant 1.000000e+00 : f32
    %51 = vector.broadcast %cst_17 : f32 to vector<2x256xf32>
    %52 = arith.select %50, %51, %48 : vector<2x256xi1>, vector<2x256xf32>
    %c7_i32 = arith.constant 7 : i32
    %53 = vector.broadcast %c7_i32 : i32 to vector<2x256xi32>
    %54 = arith.cmpi eq, %4, %53 : vector<2x256xi32>
    %cst_18 = arith.constant 1.000000e+00 : f32
    %55 = vector.broadcast %cst_18 : f32 to vector<2x256xf32>
    %56 = arith.select %54, %55, %52 : vector<2x256xi1>, vector<2x256xf32>
    %c8_i32 = arith.constant 8 : i32
    %57 = vector.broadcast %c8_i32 : i32 to vector<2x256xi32>
    %58 = arith.cmpi eq, %4, %57 : vector<2x256xi32>
    %cst_19 = arith.constant 1.000000e+00 : f32
    %59 = vector.broadcast %cst_19 : f32 to vector<2x256xf32>
    %60 = arith.select %58, %59, %56 : vector<2x256xi1>, vector<2x256xf32>
    %61 = arith.mulf %60, %23 : vector<2x256xf32>
    %cst_20 = arith.constant 0.000000e+00 : f32
    %62 = vector.broadcast %cst_20 : f32 to vector<2x256xf32>
    %63 = arith.subf %62, %61 : vector<2x256xf32>
    %64 = arith.mulf %63, %19 : vector<2x256xf32>
    %c0_21 = arith.constant 0 : index
    %c0_22 = arith.constant 0 : index
    %c0_23 = arith.constant 0 : index
    %65 = vector.load %arg4[%c0_21, %c0_22, %c0_23] : memref<2x4x256xf32, #tpu.memory_space<vmem>>, vector<2x4x256xf32>
    %c0_24 = arith.constant 0 : index
    %c0_25 = arith.constant 0 : index
    %c0_26 = arith.constant 0 : index
    %66 = vector.load %arg5[%c0_24, %c0_25, %c0_26] : memref<2x4x256xf32, #tpu.memory_space<vmem>>, vector<2x4x256xf32>
    %c0_27 = arith.constant 0 : index
    %c0_28 = arith.constant 0 : index
    %c0_29 = arith.constant 0 : index
    %67 = vector.load %arg6[%c0_27, %c0_28, %c0_29] : memref<1x4x256xf32, #tpu.memory_space<vmem>>, vector<1x4x256xf32>
    %c0_i32_30 = arith.constant 0 : i32
    %68 = vector.broadcast %c0_i32_30 : i32 to vector<2x256xi32>
    %69 = arith.cmpi sgt, %4, %68 : vector<2x256xi32>
    %70 = vector.extract_strided_slice %67 {offsets = [0, 0, 0], sizes = [1, 2, 256], strides = [1, 1, 1]} : vector<1x4x256xf32> to vector<1x2x256xf32>
    %71 = vector.extract_strided_slice %67 {offsets = [0, 2, 0], sizes = [1, 2, 256], strides = [1, 1, 1]} : vector<1x4x256xf32> to vector<1x2x256xf32>
    %72 = vector.extract_strided_slice %66 {offsets = [0, 0, 0], sizes = [2, 2, 256], strides = [1, 1, 1]} : vector<2x4x256xf32> to vector<2x2x256xf32>
    %73 = vector.broadcast %70 : vector<1x2x256xf32> to vector<2x2x256xf32>
    %74 = arith.subf %72, %73 : vector<2x2x256xf32>
    %cst_31 = arith.constant 1.000000e+01 : f32
    %75 = vector.broadcast %cst_31 : f32 to vector<2x2x256xf32>
    %76 = arith.mulf %75, %74 : vector<2x2x256xf32>
    %77 = vector.broadcast %71 : vector<1x2x256xf32> to vector<2x2x256xf32>
    %78 = arith.divf %76, %77 : vector<2x2x256xf32>
    %79 = vector.shape_cast %69 : vector<2x256xi1> to vector<2x1x256xi1>
    %80 = vector.extract_strided_slice %66 {offsets = [0, 2, 0], sizes = [2, 2, 256], strides = [1, 1, 1]} : vector<2x4x256xf32> to vector<2x2x256xf32>
    %81 = vector.broadcast %71 : vector<1x2x256xf32> to vector<2x2x256xf32>
    %82 = arith.divf %80, %81 : vector<2x2x256xf32>
    %cst_32 = arith.constant 1.000000e+00 : f32
    %83 = vector.shape_cast %79 : vector<2x1x256xi1> to vector<2x1x256xi1>
    %84 = vector.broadcast %83 : vector<2x1x256xi1> to vector<2x2x256xi1>
    %85 = vector.broadcast %cst_32 : f32 to vector<2x2x256xf32>
    %86 = arith.select %84, %82, %85 : vector<2x2x256xi1>, vector<2x2x256xf32>
    %87 = math.log %86 : vector<2x2x256xf32>
    %cst_33 = arith.constant 5.000000e+00 : f32
    %88 = vector.broadcast %cst_33 : f32 to vector<2x2x256xf32>
    %89 = arith.mulf %88, %87 : vector<2x2x256xf32>
    %90 = vector.extract_strided_slice %65 {offsets = [0, 0, 0], sizes = [2, 2, 256], strides = [1, 1, 1]} : vector<2x4x256xf32> to vector<2x2x256xf32>
    %91 = arith.subf %90, %78 : vector<2x2x256xf32>
    %92 = vector.extract_strided_slice %65 {offsets = [0, 2, 0], sizes = [2, 2, 256], strides = [1, 1, 1]} : vector<2x4x256xf32> to vector<2x2x256xf32>
    %93 = arith.subf %92, %89 : vector<2x2x256xf32>
    %94 = math.absf %91 : vector<2x2x256xf32>
    %cst_34 = arith.constant 1.000000e+00 : f32
    %95 = vector.broadcast %cst_34 : f32 to vector<2x2x256xf32>
    %96 = arith.cmpf olt, %94, %95 : vector<2x2x256xf32>
    %cst_35 = arith.constant 5.000000e-01 : f32
    %97 = vector.broadcast %cst_35 : f32 to vector<2x2x256xf32>
    %98 = arith.mulf %97, %91 : vector<2x2x256xf32>
    %99 = arith.mulf %98, %91 : vector<2x2x256xf32>
    %cst_36 = arith.constant 5.000000e-01 : f32
    %100 = vector.broadcast %cst_36 : f32 to vector<2x2x256xf32>
    %101 = arith.subf %94, %100 : vector<2x2x256xf32>
    %102 = arith.select %96, %99, %101 : vector<2x2x256xi1>, vector<2x2x256xf32>
    %103 = math.absf %93 : vector<2x2x256xf32>
    %cst_37 = arith.constant 1.000000e+00 : f32
    %104 = vector.broadcast %cst_37 : f32 to vector<2x2x256xf32>
    %105 = arith.cmpf olt, %103, %104 : vector<2x2x256xf32>
    %cst_38 = arith.constant 5.000000e-01 : f32
    %106 = vector.broadcast %cst_38 : f32 to vector<2x2x256xf32>
    %107 = arith.mulf %106, %93 : vector<2x2x256xf32>
    %108 = arith.mulf %107, %93 : vector<2x2x256xf32>
    %cst_39 = arith.constant 5.000000e-01 : f32
    %109 = vector.broadcast %cst_39 : f32 to vector<2x2x256xf32>
    %110 = arith.subf %103, %109 : vector<2x2x256xf32>
    %111 = arith.select %105, %108, %110 : vector<2x2x256xi1>, vector<2x2x256xf32>
    %112 = arith.addf %102, %111 : vector<2x2x256xf32>
    %cst_40 = arith.constant dense<0.000000e+00> : vector<2x256xf32>
    %113 = vector.multi_reduction <add>, %112, %cst_40 [1] : vector<2x2x256xf32> to vector<2x256xf32>
    %c0_41 = arith.constant 0 : index
    %c0_42 = arith.constant 0 : index
    %114 = vector.load %arg8[%c0_41, %c0_42] : memref<2x256xf32, #tpu.memory_space<vmem>>, vector<2x256xf32>
    %115 = arith.addf %114, %64 : vector<2x256xf32>
    %c0_43 = arith.constant 0 : index
    %c0_44 = arith.constant 0 : index
    %116 = vector.load %arg8[%c0_43, %c0_44] : memref<2x256xf32, #tpu.memory_space<vmem>>, vector<2x256xf32>
    tpu.vector_store %arg8[%c0_43, %c0_44], %115 {strides = array<i32>} : memref<2x256xf32, #tpu.memory_space<vmem>>, vector<2x256xf32>,
    %c0_45 = arith.constant 0 : index
    %c0_46 = arith.constant 0 : index
    %117 = vector.load %arg9[%c0_45, %c0_46] : memref<2x256xf32, #tpu.memory_space<vmem>>, vector<2x256xf32>
    %cst_47 = arith.constant 0.000000e+00 : f32
    %118 = vector.broadcast %cst_47 : f32 to vector<2x256xf32>
    %119 = arith.select %69, %113, %118 : vector<2x256xi1>, vector<2x256xf32>
    %120 = arith.addf %117, %119 : vector<2x256xf32>
    %c0_48 = arith.constant 0 : index
    %c0_49 = arith.constant 0 : index
    %121 = vector.load %arg9[%c0_48, %c0_49] : memref<2x256xf32, #tpu.memory_space<vmem>>, vector<2x256xf32>
    tpu.vector_store %arg9[%c0_48, %c0_49], %120 {strides = array<i32>} : memref<2x256xf32, #tpu.memory_space<vmem>>, vector<2x256xf32>,
    %c0_50 = arith.constant 0 : index
    %c0_51 = arith.constant 0 : index
    %122 = vector.load %arg10[%c0_50, %c0_51] : memref<2x256xf32, #tpu.memory_space<vmem>>, vector<2x256xf32>
    %123 = arith.extui %69 : vector<2x256xi1> to vector<2x256xi32>
    %124 = arith.sitofp %123 : vector<2x256xi32> to vector<2x256xf32>
    %125 = arith.addf %122, %124 : vector<2x256xf32>
    %c0_52 = arith.constant 0 : index
    %c0_53 = arith.constant 0 : index
    %126 = vector.load %arg10[%c0_52, %c0_53] : memref<2x256xf32, #tpu.memory_space<vmem>>, vector<2x256xf32>
    tpu.vector_store %arg10[%c0_52, %c0_53], %125 {strides = array<i32>} : memref<2x256xf32, #tpu.memory_space<vmem>>, vector<2x256xf32>,
    %c0_i32_54 = arith.constant 0 : i32
    %127 = arith.cmpi eq, %arg1, %c0_i32_54 : i32
    %128 = arith.extui %127 : i1 to i32
    %c0_i32_55 = arith.constant 0 : i32
    %129 = arith.cmpi ne, %128, %c0_i32_55 : i32
    scf.if %129 {
      %c0_56 = arith.constant 0 : index
      %c0_57 = arith.constant 0 : index
      %130 = vector.load %arg8[%c0_56, %c0_57] : memref<2x256xf32, #tpu.memory_space<vmem>>, vector<2x256xf32>
      %131 = vector.shape_cast %130 : vector<2x256xf32> to vector<1x2x256xf32>
      %cst_58 = arith.constant dense<0.000000e+00> : vector<1xf32>
      %132 = vector.multi_reduction <add>, %131, %cst_58 [1, 2] : vector<1x2x256xf32> to vector<1xf32>
      %133 = vector.shape_cast %132 : vector<1xf32> to vector<1x1x1xf32>
      %134 = vector.extract %133[0, 0, 0] : f32 from vector<1x1x1xf32>
      %c0_59 = arith.constant 0 : index
      %c0_60 = arith.constant 0 : index
      %135 = vector.load %arg9[%c0_59, %c0_60] : memref<2x256xf32, #tpu.memory_space<vmem>>, vector<2x256xf32>
      %136 = vector.shape_cast %135 : vector<2x256xf32> to vector<1x2x256xf32>
      %cst_61 = arith.constant dense<0.000000e+00> : vector<1xf32>
      %137 = vector.multi_reduction <add>, %136, %cst_61 [1, 2] : vector<1x2x256xf32> to vector<1xf32>
      %138 = vector.shape_cast %137 : vector<1xf32> to vector<1x1x1xf32>
      %139 = vector.extract %138[0, 0, 0] : f32 from vector<1x1x1xf32>
      %c0_62 = arith.constant 0 : index
      %c0_63 = arith.constant 0 : index
      %140 = vector.load %arg10[%c0_62, %c0_63] : memref<2x256xf32, #tpu.memory_space<vmem>>, vector<2x256xf32>
      %141 = vector.shape_cast %140 : vector<2x256xf32> to vector<1x2x256xf32>
      %cst_64 = arith.constant dense<0.000000e+00> : vector<1xf32>
      %142 = vector.multi_reduction <add>, %141, %cst_64 [1, 2] : vector<1x2x256xf32> to vector<1xf32>
      %143 = vector.shape_cast %142 : vector<1xf32> to vector<1x1x1xf32>
      %144 = vector.extract %143[0, 0, 0] : f32 from vector<1x1x1xf32>
      %145 = tpu.iota {dimensions = array<i32: 0>} : vector<8x128xi32>
      %146 = tpu.iota {dimensions = array<i32: 1>} : vector<8x128xi32>
      %c0_i32_65 = arith.constant 0 : i32
      %147 = vector.broadcast %c0_i32_65 : i32 to vector<8x128xi32>
      %148 = arith.cmpi eq, %145, %147 : vector<8x128xi32>
      %c0_i32_66 = arith.constant 0 : i32
      %149 = vector.broadcast %c0_i32_66 : i32 to vector<8x128xi32>
      %150 = arith.cmpi eq, %146, %149 : vector<8x128xi32>
      %151 = arith.andi %148, %150 : vector<8x128xi1>
      %c1_i32_67 = arith.constant 1 : i32
      %152 = vector.broadcast %c1_i32_67 : i32 to vector<8x128xi32>
      %153 = arith.cmpi eq, %146, %152 : vector<8x128xi32>
      %154 = arith.andi %148, %153 : vector<8x128xi1>
      %c2_i32_68 = arith.constant 2 : i32
      %155 = vector.broadcast %c2_i32_68 : i32 to vector<8x128xi32>
      %156 = arith.cmpi eq, %146, %155 : vector<8x128xi32>
      %157 = arith.andi %148, %156 : vector<8x128xi1>
      %cst_69 = arith.constant 0.000000e+00 : f32
      %158 = vector.broadcast %144 : f32 to vector<8x128xf32>
      %159 = vector.broadcast %cst_69 : f32 to vector<8x128xf32>
      %160 = arith.select %157, %158, %159 : vector<8x128xi1>, vector<8x128xf32>
      %161 = vector.broadcast %139 : f32 to vector<8x128xf32>
      %162 = arith.select %154, %161, %160 : vector<8x128xi1>, vector<8x128xf32>
      %163 = vector.broadcast %134 : f32 to vector<8x128xf32>
      %164 = arith.select %151, %163, %162 : vector<8x128xi1>, vector<8x128xf32>
      %c0_70 = arith.constant 0 : index
      %c0_71 = arith.constant 0 : index
      %165 = vector.load %arg7[%c0_70, %c0_71] : memref<8x128xf32, #tpu.memory_space<vmem>>, vector<8x128xf32>
      tpu.vector_store %arg7[%c0_70, %c0_71], %164 {strides = array<i32>} : memref<8x128xf32, #tpu.memory_space<vmem>>, vector<8x128xf32>,
    } else {
    }
    return
  }
  func.func @transform_0(%arg0: i32, %arg1: i32) -> (i32, i32, i32) {
    %c1_i32 = arith.constant 1 : i32
    %0 = arith.muli %arg0, %c1_i32 : i32
    %1 = arith.addi %0, %arg1 : i32
    %c0_i32 = arith.constant 0 : i32
    %c0_i32_0 = arith.constant 0 : i32
    %c0_i32_1 = arith.constant 0 : i32
    return %c0_i32, %c0_i32_0, %1 : i32, i32, i32
  }
  func.func @transform_1(%arg0: i32, %arg1: i32) -> (i32, i32) {
    %c1_i32 = arith.constant 1 : i32
    %0 = arith.muli %arg0, %c1_i32 : i32
    %1 = arith.addi %0, %arg1 : i32
    %c0_i32 = arith.constant 0 : i32
    %c0_i32_0 = arith.constant 0 : i32
    return %c0_i32, %1 : i32, i32
  }
  func.func @transform_2(%arg0: i32, %arg1: i32) -> (i32, i32, i32) {
    %c1_i32 = arith.constant 1 : i32
    %0 = arith.muli %arg0, %c1_i32 : i32
    %1 = arith.addi %0, %arg1 : i32
    %c0_i32 = arith.constant 0 : i32
    %c0_i32_0 = arith.constant 0 : i32
    %c0_i32_1 = arith.constant 0 : i32
    return %c0_i32, %c0_i32_0, %1 : i32, i32, i32
  }
  func.func @transform_3(%arg0: i32, %arg1: i32) -> (i32, i32, i32) {
    %c1_i32 = arith.constant 1 : i32
    %0 = arith.muli %arg0, %c1_i32 : i32
    %1 = arith.addi %0, %arg1 : i32
    %c0_i32 = arith.constant 0 : i32
    %c0_i32_0 = arith.constant 0 : i32
    %c0_i32_1 = arith.constant 0 : i32
    return %c0_i32, %c0_i32_0, %1 : i32, i32, i32
  }
  func.func @transform_4(%arg0: i32, %arg1: i32) -> (i32, i32, i32) {
    %c1_i32 = arith.constant 1 : i32
    %0 = arith.muli %arg0, %c1_i32 : i32
    %1 = arith.addi %0, %arg1 : i32
    %c0_i32 = arith.constant 0 : i32
    %c0_i32_0 = arith.constant 0 : i32
    %c0_i32_1 = arith.constant 0 : i32
    return %c0_i32, %c0_i32_0, %1 : i32, i32, i32
  }
  func.func @transform_5(%arg0: i32, %arg1: i32) -> (i32, i32) {
    %c0_i32 = arith.constant 0 : i32
    %c0_i32_0 = arith.constant 0 : i32
    return %arg0, %c0_i32 : i32, i32
  }
}

</mosaic_0001>

<bundles_post_ra>
// kernel: tpu_custom_call.1
= control target key start
LH: loop header
LB: loop body
LE: loop exit
PB: predicated region body
PF: predicated region fallthrough
CT: control target
= control target key end

     0   :  { %vm147_vm0 = vcmask 1040384   ;;  %v850_v3 = vmov 0.0   ;;  %v244_v14 = vlaneseq  ;;  %s1181_s0 = inlined_call_operand.vmem [shape: f32[2,9,256], index: 0, kind: input, shape index: {}]   ;;  %s1182_s1 = inlined_call_operand.vmem [shape: s32[2,256], index: 1, kind: input, shape index: {}]   ;;  %s1183_s2 = inlined_call_operand.vmem [shape: f32[2,4,256], index: 2, kind: input, shape index: {}]   ;;  %s1184_s3 = inlined_call_operand.vmem [shape: f32[2,4,256], index: 3, kind: input, shape index: {}]   ;;  %s1185_s4 = inlined_call_operand.vmem [shape: f32[1,4,256], index: 4, kind: input, shape index: {}]   ;;  %s1186_s5 = inlined_call_operand.hbm [shape: f32[8,128], index: 5, kind: output, shape index: {}]  }
   0x1   :  { %v888_v0 = vld [vmem:[%s1181_s0] sm:$0xff]  ;;  %v893_v1 = vld [vmem:[%s1181_s0 + $0x8] sm:$0xff]  ;;  %v898_v2 = vld [vmem:[%s1181_s0 + $0x10] sm:$0x1]  ;;  %137 = vst [vmem:[#allocation4] sm:$0xf] %v850_v3 }
   0x2   :  { %v904_v4 = vld [vmem:[%s1181_s0 + $0x18] sm:$0x1]  ;;  %v909_v5 = vld [vmem:[%s1181_s0 + $0x20] sm:$0xff]  ;;  %v914_v6 = vld [vmem:[%s1181_s0 + $0x28] sm:$0xff]  ;;  %v148_v7 = vsel %vm147_vm0, %v898_v2, -inf }
   0x3   :  { %135 = vst [vmem:[#allocation2] sm:$0xf] %v850_v3  ;;  %136 = vst [vmem:[#allocation3] sm:$0xf] %v850_v3  ;;  %v923_v8 = vld [vmem:[%s1181_s0 + $0x30] sm:$0x1]  ;;  %v149_v10 = vmax.f32 %v888_v0, %v148_v7 }
   0x4   :  { %v928_v9 = vld [vmem:[%s1181_s0 + $0x38] sm:$0x1]  ;;  %v156_v11 = vsel %vm147_vm0, %v904_v4, -inf  ;;  %v164_v12 = vsel %vm147_vm0, %v923_v8, -inf  ;;  %v940_v15 = vld [vmem:[%s1182_s1] sm:$0xf] }
   0x5   :  { %v172_v13 = vsel %vm147_vm0, %v928_v9, -inf  ;;  %v150_v16 = vrot.slane %v149_v10, 4  ;;  %v157_v17 = vmax.f32 %v893_v1, %v156_v11  ;;  %v165_v18 = vmax.f32 %v909_v5, %v164_v12 }
   0x6   :  { %v173_v19 = vmax.f32 %v914_v6, %v172_v13 }
   0x7   :  { %v151_v20 = vmax.f32 %v149_v10, %v150_v16  ;;  %v158_v21 = vrot.slane %v157_v17, 4  ;;  %v166_v22 = vrot.slane %v165_v18, 4 }
   0x8   :  { %v174_v23 = vrot.slane %v173_v19, 4 }
   0x9   :  { %10 = vsyncpa [#allocation6], 0  ;;  %v946_v24 = vshrl.u32 %v244_v14, 7  ;;  %v851_v25 = vmov 1966171168   ;;  %vm427_vm1 = vcmp.gt.s32.totalorder %v940_v15, 0  ;;  %v159_v28 = vmax.f32 %v157_v17, %v158_v21 }
   0xa   :  { %v248_v26 = vunpack.c.l.s4 %v851_v25  ;;  %v152_v27 = vrot.slane %v151_v20, 2  ;;  %v167_v29 = vmax.f32 %v165_v18, %v166_v22  ;;  %v175_v30 = vmax.f32 %v173_v19, %v174_v23  ;;  %v952_v36 = vld [vmem:[%s1185_s4] sm:$0xff]  ;;  %v979_v55 = vld [vmem:[%s1184_s3 + $0x8] sm:$0xff]  ;;  %s854_s19 = smov [#allocation5]  }
   0xb   :  { %v160_v33 = vrot.slane %v159_v28, 2  ;;  %v955_v37 = vadd.s32 8, %v946_v24  ;;  %v760_v39 = vrot.slane %v952_v36, 10  ;;  %v852_v40 = vmov 0   ;;  %v965_v46 = vld [vmem:[%s1184_s3] sm:$0xff]  ;;  %s722_s20 = sshll.u32 %s854_s19, 4  ;;  %s723_s20 = int_to_ptr.vmem [resolvable:$true] %s722_s20 }
   0xc   :  { %v249_v31 = vunpack.c.0.s8 %v248_v26  ;;  %v153_v32 = vmax.f32 %v151_v20, %v152_v27  ;;  %v168_v34 = vrot.slane %v167_v29, 2  ;;  %v176_v35 = vrot.slane %v175_v30, 2  ;;  %s826_s21 = scalar_lea.vmem %s723_s20, 128  ;;  %p831_p1 = scmp.lt.s32.totalorder %s723_s20, %s723_s20 }
   0xd   :  { %v439_v41 = vsel %vm427_vm1, 1, %v852_v40  ;;  %v161_v43 = vmax.f32 %v159_v28, %v160_v33  ;;  %v969_v48 = vsub.s32 0, %v946_v24  ;;  %v972_v49 = vsub.s32 1, %v946_v24  ;;  %p827_p0 = scmp.ne.s32.totalorder %s723_s20, %s826_s21  ;;  %p832_p2 = scmp.lt.s32.totalorder %s826_s21, %s826_s21 }
   0xe   :  { %v252_v38 = vsub.s32 %v249_v31, %v946_v24  ;;  %v154_v42 = vrot.slane %v153_v32, 1  ;;  %v169_v44 = vmax.f32 %v167_v29, %v168_v34  ;;  %v177_v45 = vmax.f32 %v175_v30, %v176_v35 }
   0xf   :  { %v428_v50 = vsub.f32 %v965_v46, %v952_v36  ;;  %v162_v52 = vrot.slane %v161_v43, 1  ;;  %v429_v57 = vsub.f32 %v979_v55, %v952_v36  ;;  %782 = vrcp.f32 %v760_v39  ;;  %p833_p3 = por %p832_p2, %p831_p1 }
  0x10   :  { %v253_v47 = vrot.slane %v940_v15, %v252_v38  ;;  %v155_v51 = vmax.f32 %v153_v32, %v154_v42  ;;  %v170_v53 = vrot.slane %v169_v44, 1  ;;  %v178_v54 = vrot.slane %v177_v45, 1 }
  0x11   :  { %v983_v58 = vrot.slane %v439_v41, %v252_v38  ;;  %v163_v59 = vmax.f32 %v161_v43, %v162_v52  ;;  %v430_v38 = vmul.f32 10.0, %v428_v50  ;;  %vm339_vm12 = vcmp.eq.s32.totalorder %v940_v15, 0  ;;  %p834_p4 = pnand %p833_p3, %p827_p0 }
  0x12   :  { %v254_v56 = vcombine.high %v253_v47, %v253_v47  ;;  %v171_v60 = vmax.f32 %v169_v44, %v170_v53  ;;  %v179_v61 = vmax.f32 %v177_v45, %v178_v54  ;;  %v180_v62 = vsub.f32 %v888_v0, %v155_v51 }
  0x13   :  { %v182_v63 = vsub.f32 %v898_v2, %v155_v51  ;;  %v258_v7 = vrot.slane %v253_v47, %v969_v48  ;;  %v262_v10 = vrot.slane %v253_v47, %v972_v49  ;;  %v181_v12 = vsub.f32 %v893_v1, %v163_v59 }
  0x14   :  { %v266_v11 = vrot.slane %v254_v56, %v969_v48  ;;  %v183_v13 = vsub.f32 %v904_v4, %v163_v59  ;;  %v184_v16 = vsub.f32 %v909_v5, %v171_v60  ;;  %v185_v17 = vsub.f32 %v914_v6, %v179_v61  ;;  %v621_v59 = vld [vmem:[#allocation4] sm:$0xf] }
  0x15   :  { %v186_v18 = vsub.f32 %v923_v8, %v171_v60  ;;  %v187_v0 = vsub.f32 %v928_v9, %v179_v61  ;;  %v188_v19 = vmul.f32 1.442695, %v180_v62  ;;  %v192_v2 = vmul.f32 1.442695, %v182_v63 }
  0x16   :  { %v190_v20 = vmul.f32 1.442695, %v181_v12  ;;  %v194_v21 = vmul.f32 1.442695, %v183_v13  ;;  %v270_v22 = vrot.slane %v254_v56, %v972_v49  ;;  %v447_v23 = vcombine.high %v983_v58, %v983_v58 }
  0x17   :  { %784 = vpow2.f32 %v188_v19  ;;  %v196_v1 = vmul.f32 1.442695, %v184_v16  ;;  %vm271_vm2 = vcmp.eq.s32.totalorder %v946_v24, %v258_v7  ;;  %vm272_vm3 = vcmp.eq.s32.totalorder %v946_v24, %v262_v10 }
  0x18   :  { %786 = vpow2.f32 %v190_v20  ;;  %v198_v4 = vmul.f32 1.442695, %v185_v17  ;;  %vm273_vm4 = vcmp.eq.s32.totalorder %v955_v37, %v258_v7  ;;  %vm274_vm5 = vcmp.eq.s32.totalorder %v955_v37, %v262_v10 }
  0x19   :  { %788 = vpow2.f32 %v192_v2  ;;  %v200_v5 = vmul.f32 1.442695, %v186_v18  ;;  %v202_v6 = vmul.f32 1.442695, %v187_v0  ;;  %vm277_vm6 = vcmp.eq.s32.totalorder %v955_v37, %v266_v11  ;;  %v783_v25 = vpop.eup %782 }
  0x1a   :  { %790 = vpow2.f32 %v194_v21  ;;  %vm278_vm7 = vcmp.eq.s32.totalorder %v955_v37, %v270_v22  ;;  %v279_v8 = vsel %vm271_vm2, %v180_v62, 0.0  ;;  %v281_v9 = vsel %vm273_vm4, %v182_v63, 0.0 }
  0x1b   :  { %792 = vpow2.f32 %v196_v1  ;;  %vm275_vm8 = vcmp.eq.s32.totalorder %v946_v24, %v266_v11  ;;  %v280_v26 = vsel %vm272_vm3, %v181_v12, 0.0  ;;  %v282_v27 = vsel %vm274_vm5, %v183_v13, 0.0  ;;  %v1059_v1 = vld [vmem:[%s1183_s2 + $0x8] sm:$0xff] }
  0x1c   :  { %794 = vpow2.f32 %v198_v4  ;;  %vm276_vm9 = vcmp.eq.s32.totalorder %v946_v24, %v270_v22  ;;  %v285_v28 = vsel %vm277_vm6, %v186_v18, 0.0  ;;  %v287_v29 = vsel %vm147_vm0, %v281_v9, 0.0 }
  0x1d   :  { %796 = vpow2.f32 %v200_v5  ;;  %v286_v30 = vsel %vm278_vm7, %v187_v0, 0.0  ;;  %v288_v31 = vadd.f32 %v287_v29, %v279_v8  ;;  %v295_v32 = vsel %vm147_vm0, %v282_v27, 0.0 }
  0x1e   :  { %798 = vpow2.f32 %v202_v6  ;;  %v296_v33 = vadd.f32 %v295_v32, %v280_v26  ;;  %v283_v34 = vsel %vm275_vm8, %v184_v16, 0.0  ;;  %v284_v35 = vsel %vm276_vm9, %v185_v17, 0.0  ;;  %v1040_v16 = vld [vmem:[%s1183_s2] sm:$0xff] }
  0x1f   :  { %v303_v37 = vsel %vm147_vm0, %v285_v28, 0.0  ;;  %v289_v39 = vrot.slane %v288_v31, 4  ;;  %v311_v42 = vsel %vm147_vm0, %v286_v30, 0.0  ;;  %vm448_vm10 = vcmp.ne.s32.totalorder %v983_v58, 0 }
  0x20   :  { %v297_v41 = vrot.slane %v296_v33, 4  ;;  %v431_v44 = vmul.f32 10.0, %v429_v57  ;;  %vm449_vm11 = vcmp.ne.s32.totalorder %v447_v23, 0  ;;  %800 = vrcp.f32 %v952_v36 }
  0x21   :  { %v785_v43 = vpop.eup %784  ;;  %v304_v47 = vadd.f32 %v303_v37, %v283_v34  ;;  %v453_v51 = vsel %vm448_vm10, 1, %v852_v40  ;;  %v1020_v53 = vadd.f32 %v311_v42, %v284_v35  ;;  %v1022_v54 = vadd.f32 %v289_v39, %v288_v31 }
  0x22   :  { %v787_v45 = vpop.eup %786  ;;  %v1024_v56 = vadd.f32 %v297_v41, %v296_v33  ;;  %v437_v58 = vmul.f32 %v783_v25, %v430_v38  ;;  %v454_v57 = vsel %vm449_vm11, 1, %v852_v40  ;;  %v1028_v36 = vsel %vm339_vm12, 0.01, %v850_v3 }
  0x23   :  { %v789_v52 = vpop.eup %788  ;;  %v438_v61 = vmul.f32 %v783_v25, %v431_v44  ;;  %v458_v62 = vrot.slane %v453_v51, %v969_v48  ;;  %v305_v7 = vrot.slane %v304_v47, 4  ;;  %v462_v10 = vrot.slane %v453_v51, %v972_v49 }
  0x24   :  { %v791_v50 = vpop.eup %790  ;;  %v767_v11 = vsel %vm427_vm1, 1.0, %v850_v3  ;;  %v204_v12 = vsel %vm147_vm0, %v789_v52, 0.0  ;;  %v313_v40 = vrot.slane %v1020_v53, 4  ;;  %v466_v17 = vrot.slane %v454_v57, %v969_v48 }
  0x25   :  { %v793_v60 = vpop.eup %792  ;;  %v470_v18 = vrot.slane %v454_v57, %v972_v49  ;;  %v623_v0 = vadd.f32 %v767_v11, %v621_v59  ;;  %v291_v2 = vrot.slane %v1022_v54, 2  ;;  %v299_v3 = vrot.slane %v1024_v56, 2 }
  0x26   :  { %v795_v63 = vpop.eup %794  ;;  %v1047_v20 = vsub.f32 %v1040_v16, %v437_v58  ;;  %v205_v21 = vadd.f32 %v785_v43, %v204_v12  ;;  %vm1049_vm13 = vcmp.eq.s32.totalorder %v458_v62, 1  ;;  %v212_v23 = vsel %vm147_vm0, %v791_v50, 0.0 }
  0x27   :  { %v797_v13 = vpop.eup %796  ;;  %624 = vst [vmem:[#allocation4] sm:$0xf] %v623_v0  ;;  %vm1061_vm14 = vcmp.eq.s32.totalorder %v462_v10, 1  ;;  %vm557_vm15 = vcmask 1041408   ;;  %v213_v6 = vadd.f32 %v787_v45, %v212_v23  ;;  %vm1065_vm2 = vcmp.eq.s32.totalorder %v466_v17, 1 }
  0x28   :  { %v799_v19 = vpop.eup %798  ;;  %v220_v48 = vsel %vm147_vm0, %v797_v13, 0.0  ;;  %v206_v5 = vrot.slane %v205_v21, 4  ;;  %vm1069_vm3 = vcmp.eq.s32.totalorder %v470_v18, 1  ;;  %v1074_v27 = vsub.f32 %v1059_v1, %v438_v61 }
  0x29   :  { %v228_v49 = vsel %vm147_vm0, %v799_v19, 0.0  ;;  %v221_v8 = vadd.f32 %v793_v60, %v220_v48  ;;  %v214_v32 = vrot.slane %v213_v6, 4  ;;  %v517_v33 = vand.u32 2147483647, %v1047_v20 }
  0x2a   :  { %v801_v9 = vpop.eup %800  ;;  %v229_v28 = vadd.f32 %v795_v63, %v228_v49  ;;  %v207_v31 = vadd.f32 %v206_v5, %v205_v21  ;;  %v306_v37 = vadd.f32 %v305_v7, %v304_v47  ;;  %v1090_v17 = vmul.f32 0.5, %v1047_v20 }
  0x2b   :  { %v451_v29 = vmul.f32 %v801_v9, %v965_v46  ;;  %v452_v30 = vmul.f32 %v801_v9, %v979_v55  ;;  %v222_v34 = vrot.slane %v221_v8, 4  ;;  %v215_v44 = vadd.f32 %v214_v32, %v213_v6 }
  0x2c   :  { %v230_v35 = vrot.slane %v229_v28, 4  ;;  %v208_v43 = vrot.slane %v207_v31, 2  ;;  %v292_v23 = vadd.f32 %v291_v2, %v1022_v54  ;;  %v307_v48 = vrot.slane %v306_v37, 2 }
  0x2d   :  { %v477_v38 = vcombine.high %v451_v29, %v451_v29  ;;  %v478_v39 = vcombine.high %v452_v30, %v452_v30  ;;  %v479_v41 = vrot.slane %v451_v29, 2  ;;  %v481_v42 = vrot.slane %v452_v30, 2 }
  0x2e   :  { %v223_v45 = vadd.f32 %v222_v34, %v221_v8  ;;  %v231_v51 = vadd.f32 %v230_v35, %v229_v28  ;;  %v770_v58 = vld.sshfl [vmem:[#allocation4] sm:$0x33 pattern:$0x76325410]  ;;  %v209_v57 = vadd.f32 %v208_v43, %v207_v31  ;;  %v216_v47 = vrot.slane %v215_v44, 2 }
  0x2f   :  { %v480_v52 = vrot.slane %v477_v38, 2  ;;  %v482_v50 = vrot.slane %v478_v39, 2  ;;  %v487_v46 = vsel %vm1049_vm13, %v479_v41, 1.0  ;;  %v489_v55 = vsel %vm1065_vm2, %v481_v42, 1.0 }
  0x30   :  { %802 = vlog2.f32 %v487_v46  ;;  %v224_v59 = vrot.slane %v223_v45, 2  ;;  %v685_v62 = vcombine.high %v770_v58, %v770_v58  ;;  %v688_v63 = vsel %vm557_vm15, %v770_v58, 0.0 }
  0x31   :  { %v488_v60 = vsel %vm1061_vm14, %v480_v52, 1.0  ;;  %v490_v61 = vsel %vm1069_vm3, %v482_v50, 1.0  ;;  %804 = vlog2.f32 %v489_v55  ;;  %v210_v7 = vrot.slane %v209_v57, 1 }
  0x32   :  { %806 = vlog2.f32 %v488_v60  ;;  %v217_v10 = vadd.f32 %v216_v47, %v215_v44  ;;  %v689_v11 = vsel %vm557_vm15, %v685_v62, 0.0  ;;  %v225_v12 = vadd.f32 %v224_v59, %v223_v45 }
  0x33   :  { %808 = vlog2.f32 %v490_v61  ;;  %v232_v13 = vrot.slane %v231_v51, 2  ;;  %v690_v18 = vadd.f32 %v689_v11, %v688_v63  ;;  %v211_v0 = vadd.f32 %v210_v7, %v209_v57 }
  0x34   :  { %v218_v19 = vrot.slane %v217_v10, 1  ;;  %v226_v21 = vrot.slane %v225_v12, 1  ;;  %v314_v4 = vadd.f32 %v313_v40, %v1020_v53  ;;  %vm341_vm0 = vcmp.eq.s32.totalorder %v940_v15, 1 }
  0x35   :  { %v233_v22 = vadd.f32 %v232_v13, %v231_v51  ;;  %691 = vadd.xlane.f32.xlu1 %v690_v18  ;;  %810 = vlog2.f32 %v211_v0  ;;  %v300_v8 = vadd.f32 %v299_v3, %v1024_v56  ;;  %v342_v9 = vsel %vm341_vm0, 1.0, %v1028_v36 }
  0x36   :  { %v219_v49 = vadd.f32 %v218_v19, %v217_v10  ;;  %v227_v5 = vadd.f32 %v226_v21, %v225_v12  ;;  %v315_v54 = vrot.slane %v314_v4, 2  ;;  %vm343_vm4 = vcmp.eq.s32.totalorder %v940_v15, 2 }
  0x37   :  { %v234_v6 = vrot.slane %v233_v22, 1  ;;  %vm345_vm5 = vcmp.eq.s32.totalorder %v940_v15, 3  ;;  %v293_v25 = vrot.slane %v292_v23, 1  ;;  %v344_v53 = vsel %vm343_vm4, 1.0, %v342_v9 }
  0x38   :  { %812 = vlog2.f32 %v219_v49  ;;  %v308_v26 = vadd.f32 %v307_v48, %v306_v37  ;;  %v346_v28 = vsel %vm345_vm5, 1.0, %v344_v53  ;;  %vm347_vm6 = vcmp.eq.s32.totalorder %v940_v15, 4 }
  0x39   :  { %v235_v2 = vadd.f32 %v234_v6, %v233_v22  ;;  %814 = vlog2.f32 %v227_v5  ;;  %vm349_vm7 = vcmp.eq.s32.totalorder %v940_v15, 5  ;;  %v301_v36 = vrot.slane %v300_v8, 1 }
  0x3a   :  { %v803_v40 = vpop.eup %802  ;;  %v348_v29 = vsel %vm347_vm6, 1.0, %v346_v28  ;;  %v316_v32 = vadd.f32 %v315_v54, %v314_v4  ;;  %vm351_vm8 = vcmp.eq.s32.totalorder %v940_v15, 6  ;;  %vm353_vm9 = vcmp.eq.s32.totalorder %v940_v15, 7 }
  0x3b   :  { %v805_v56 = vpop.eup %804  ;;  %v492_v3 = vmul.f32 0.6931472, %v803_v40  ;;  %816 = vlog2.f32 %v235_v2  ;;  %v350_v34 = vsel %vm349_vm7, 1.0, %v348_v29  ;;  %v309_v43 = vrot.slane %v308_v26, 1 }
  0x3c   :  { %v807_v30 = vpop.eup %806  ;;  %v496_v31 = vmul.f32 0.6931472, %v805_v56  ;;  %v352_v37 = vsel %vm351_vm8, 1.0, %v350_v34  ;;  %v518_v51 = vand.u32 2147483647, %v1074_v27  ;;  %v294_v52 = vadd.f32 %v293_v25, %v292_v23 }
  0x3d   :  { %v809_v35 = vpop.eup %808  ;;  %v494_v38 = vmul.f32 0.6931472, %v807_v30  ;;  %v499_v39 = vmul.f32 5.0, %v492_v3  ;;  %v354_v44 = vsel %vm353_vm9, 1.0, %v352_v37  ;;  %vm355_vm10 = vcmp.eq.s32.totalorder %v940_v15, 8 }
  0x3e   :  { %v498_v41 = vmul.f32 0.6931472, %v809_v35  ;;  %v501_v42 = vmul.f32 5.0, %v496_v31  ;;  %v522_v55 = vmul.f32 0.5, %v1074_v27  ;;  %v317_v58 = vrot.slane %v316_v32, 1 }
  0x3f   :  { %v500_v45 = vmul.f32 5.0, %v494_v38  ;;  %v811_v50 = vpop.eup %810  ;;  %v1112_v57 = vsel %vm355_vm10, 1.0, %v354_v44  ;;  %vm1116_vm11 = vcmp.lt.f32.partialorder %v517_v33, 1.0  ;;  %v302_v61 = vadd.f32 %v301_v36, %v300_v8 }
  0x40   :  { %v502_v46 = vmul.f32 5.0, %v498_v41  ;;  %v237_v60 = vmul.f32 0.6931472, %v811_v50  ;;  %v523_v7 = vmul.f32 %v1090_v17, %v1047_v20  ;;  %v761_v10 = vadd.f32 -0.5, %v517_v33 }
  0x41   :  { %v509_v47 = vcombine.low %v499_v39, %v500_v45  ;;  %v310_v11 = vadd.f32 %v309_v43, %v308_v26  ;;  %vm1124_vm12 = vcmp.lt.f32.partialorder %v518_v51, 1.0  ;;  %v524_v22 = vmul.f32 %v522_v55, %v1074_v27 }
  0x42   :  { %v813_v62 = vpop.eup %812  ;;  %v510_v63 = vcombine.low %v501_v42, %v502_v46  ;;  %v1128_v19 = vsub.f32 %v294_v52, %v237_v60  ;;  %v318_v48 = vadd.f32 %v317_v58, %v316_v32  ;;  %v762_v20 = vadd.f32 -0.5, %v518_v51 }
  0x43   :  { %v815_v12 = vpop.eup %814  ;;  %v511_v13 = vrot.slane %v509_v47, 6  ;;  %v239_v0 = vmul.f32 0.6931472, %v813_v62  ;;  %v853_v29 = vmov 1983009808   ;;  %vm382_vm2 = vcmask 1041409  }
  0x44   :  { %v512_v21 = vrot.slane %v510_v63, 6  ;;  %v241_v23 = vmul.f32 0.6931472, %v815_v12  ;;  %v323_v4 = vmul.f32 1.442695, %v1128_v19  ;;  %v363_v30 = vunpack.c.l.s4 %v853_v29 }
  0x45   :  { %v817_v49 = vpop.eup %816  ;;  %v515_v17 = vsub.f32 %v1040_v16, %v511_v13  ;;  %v1132_v33 = vsub.f32 %v302_v61, %v239_v0  ;;  %v528_v31 = vsel %vm1124_vm12, %v524_v22, %v762_v20  ;;  %vm384_vm3 = vcmask 1043459  }
  0x46   :  { %v516_v5 = vsub.f32 %v1059_v1, %v512_v21  ;;  %v243_v6 = vmul.f32 0.6931472, %v817_v49  ;;  %v321_v8 = vsub.f32 %v310_v11, %v241_v23  ;;  %818 = vpow2.f32 %v323_v4 }
  0x47   :  { %v529_v9 = vand.u32 2147483647, %v515_v17  ;;  %v533_v54 = vmul.f32 0.5, %v515_v17  ;;  %v325_v2 = vmul.f32 1.442695, %v1132_v33  ;;  %v527_v1 = vsel %vm1116_vm11, %v523_v7, %v761_v10 }
  0x48   :  { %v530_v27 = vand.u32 2147483647, %v516_v5  ;;  %v534_v25 = vmul.f32 0.5, %v516_v5  ;;  %v322_v53 = vsub.f32 %v318_v48, %v243_v6  ;;  %v327_v40 = vmul.f32 1.442695, %v321_v8 }
  0x49   :  { %vm531_vm13 = vcmp.lt.f32.partialorder %v529_v9, 1.0  ;;  %v535_v16 = vmul.f32 %v533_v54, %v515_v17  ;;  %v763_v26 = vadd.f32 -0.5, %v529_v9  ;;  %820 = vpow2.f32 %v325_v2 }
  0x4a   :  { %vm532_vm14 = vcmp.lt.f32.partialorder %v530_v27, 1.0  ;;  %v536_v28 = vmul.f32 %v534_v25, %v516_v5  ;;  %v764_v56 = vadd.f32 -0.5, %v530_v27  ;;  %822 = vpow2.f32 %v327_v40 }
  0x4b   :  { %v539_v3 = vsel %vm531_vm13, %v535_v16, %v763_v26  ;;  %v329_v36 = vmul.f32 1.442695, %v322_v53  ;;  %v364_v37 = vunpack.c.0.s8 %v363_v30  ;;  %v405_v52 = vcombine.low %v321_v8, %v322_v53 }
  0x4c   :  { %v540_v32 = vsel %vm532_vm14, %v536_v28, %v764_v56  ;;  %v765_v34 = vrot.slane %v539_v3, 10  ;;  %v397_v11 = vcombine.low %v1128_v19, %v1132_v33  ;;  %vm386_vm0 = vcmask 1045509  }
  0x4d   :  { %v766_v35 = vrot.slane %v540_v32, 10  ;;  %824 = vpow2.f32 %v329_v36  ;;  %v367_v61 = vsub.s32 %v364_v37, %v946_v24  ;;  %vm388_vm4 = vcmask 1047559  }
  0x4e   :  { %v549_v38 = vadd.f32 %v765_v34, %v527_v1 }
  0x4f   :  { %v550_v39 = vadd.f32 %v766_v35, %v528_v31  ;;  %v412_v0 = vrot.slane %v405_v52, %v367_v61  ;;  %v404_v2 = vrot.slane %v397_v11, %v367_v61 }
  0x50   :  { %v553_v41 = vcombine.high %v549_v38, %v549_v38  ;;  %v558_v42 = vsel %vm557_vm15, %v549_v38, 0.0  ;;  %v819_v43 = vpop.eup %818 }
  0x51   :  { %v554_v44 = vcombine.high %v550_v39, %v550_v39  ;;  %v559_v45 = vrot.slane %v558_v42, 4  ;;  %v572_v51 = vsel %vm557_vm15, %v550_v39, 0.0  ;;  %v331_v55 = vsub.f32 1.0, %v819_v43 }
  0x52   :  { %v565_v50 = vsel %vm557_vm15, %v553_v41, 0.0  ;;  %v573_v46 = vrot.slane %v572_v51, 4  ;;  %v415_v27 = vrot.slane %v412_v0, 7 }
  0x53   :  { %v821_v58 = vpop.eup %820  ;;  %v560_v47 = vadd.f32 %v559_v45, %v558_v42  ;;  %v566_v59 = vrot.slane %v565_v50, 4  ;;  %v579_v60 = vsel %vm557_vm15, %v554_v44, 0.0  ;;  %v335_v23 = vmul.f32 %v331_v55, %v331_v55 }
  0x54   :  { %v823_v62 = vpop.eup %822  ;;  %v574_v63 = vadd.f32 %v573_v46, %v572_v51  ;;  %v580_v7 = vrot.slane %v579_v60, 4  ;;  %v332_v10 = vsub.f32 1.0, %v821_v58  ;;  %v416_v29 = vsel %vm382_vm2, %v415_v27, %v404_v2  ;;  %v589_v58 = vld [vmem:[#allocation3] sm:$0xf] }
  0x55   :  { %v561_v12 = vrot.slane %v560_v47, 2  ;;  %v567_v13 = vadd.f32 %v566_v59, %v565_v50  ;;  %v333_v18 = vsub.f32 1.0, %v823_v62  ;;  %v417_v35 = vsel %vm384_vm3, %v415_v27, %v416_v29  ;;  %v586_v59 = vld [vmem:[#allocation2] sm:$0xf] }
  0x56   :  { %v575_v21 = vrot.slane %v574_v63, 2  ;;  %v581_v22 = vadd.f32 %v580_v7, %v579_v60  ;;  %v336_v48 = vmul.f32 %v332_v10, %v332_v10  ;;  %v418_v43 = vsel %vm386_vm0, %v415_v27, %v417_v35 }
  0x57   :  { %v825_v49 = vpop.eup %824  ;;  %v562_v17 = vadd.f32 %v561_v12, %v560_v47  ;;  %v568_v20 = vrot.slane %v567_v13, 2  ;;  %v337_v8 = vmul.f32 %v333_v18, %v333_v18  ;;  %v419_v50 = vsel %vm388_vm4, %v415_v27, %v418_v43 }
  0x58   :  { %v576_v4 = vadd.f32 %v575_v21, %v574_v63  ;;  %v582_v5 = vrot.slane %v581_v22, 2  ;;  %v334_v6 = vsub.f32 1.0, %v825_v49  ;;  %v361_v25 = vcombine.low %v335_v23, %v336_v48 }
  0x59   :  { %v563_v9 = vrot.slane %v562_v17, 1  ;;  %v569_v54 = vadd.f32 %v568_v20, %v567_v13 }
  0x5a   :  { %v583_v19 = vadd.f32 %v582_v5, %v581_v22  ;;  %v338_v33 = vmul.f32 %v334_v6, %v334_v6  ;;  %v577_v53 = vrot.slane %v576_v4, 1  ;;  %v368_v3 = vrot.slane %v361_v25, %v367_v61 }
  0x5b   :  { %v570_v40 = vrot.slane %v569_v54, 1  ;;  %v564_v16 = vadd.f32 %v563_v9, %v562_v17 }
  0x5c   :  { %v369_v26 = vcombine.low %v337_v8, %v338_v33  ;;  %v578_v28 = vadd.f32 %v577_v53, %v576_v4  ;;  %v584_v56 = vrot.slane %v583_v19, 1 }
  0x5d   :  { %v571_v1 = vadd.f32 %v570_v40, %v569_v54 }
  0x5e   :  { %v376_v36 = vrot.slane %v369_v26, %v367_v61  ;;  %v585_v30 = vadd.f32 %v584_v56, %v583_v19  ;;  %v701_v56 = vand.u32 127, %v244_v14 }
  0x5f   :  { %v594_v31 = vcombine.low %v564_v16, %v571_v1 }
  0x60   :  { %v381_v32 = vrot.slane %v376_v36, 7  ;;  %v602_v34 = vcombine.low %v578_v28, %v585_v30  ;;  %vm705_vm5 = vcmp.eq.s32.totalorder %v701_v56, 1  ;;  %vm703_vm6 = vcmp.eq.s32.totalorder %v701_v56, 0 }
  0x61   :  { %v601_v39 = vrot.slane %v594_v31, %v367_v61 }
  0x62   :  { %v383_v38 = vsel %vm382_vm2, %v381_v32, %v368_v3  ;;  %v609_v37 = vrot.slane %v602_v34, %v367_v61 }
  0x63   :  { %v385_v41 = vsel %vm384_vm3, %v381_v32, %v383_v38 }
  0x64   :  { %v387_v42 = vsel %vm386_vm0, %v381_v32, %v385_v41  ;;  %v612_v44 = vrot.slane %v609_v37, 7 }
  0x65   :  { %v389_v45 = vsel %vm388_vm4, %v381_v32, %v387_v42 }
  0x66   :  { %v391_v51 = vmul.f32 %v389_v45, %v1112_v57  ;;  %v613_v52 = vsel %vm382_vm2, %v612_v44, %v601_v39 }
  0x67   :  { %v614_v46 = vsel %vm384_vm3, %v612_v44, %v613_v52 }
  0x68   :  { %v392_v55 = vsub.f32 0.0, %v391_v51  ;;  %v615_v47 = vsel %vm386_vm0, %v612_v44, %v614_v46 }
  0x69   :  { %v616_v60 = vsel %vm388_vm4, %v612_v44, %v615_v47 }
  0x6a   :  { %v421_v61 = vmul.f32 %v419_v50, %v392_v55  ;;  %v618_v62 = vsel %vm427_vm1, %v616_v60, 0.0  ;;  %vm702_vm1 = vcmp.eq.s32.totalorder %v946_v24, 0 }
  0x6b   :  { %v619_v63 = vadd.f32 %v618_v62, %v589_v58  ;;  %vm706_vm8 = vmand %vm702_vm1, %vm705_vm5 }
  0x6c   :  { %v587_v7 = vadd.f32 %v586_v59, %v421_v61  ;;  %vm704_vm9 = vmand %vm702_vm1, %vm703_vm6 }
  0x6d   :  { %620 = vst [vmem:[#allocation3] sm:$0xf] %v619_v63 }
  0x6e   :  { %588 = vst [vmem:[#allocation2] sm:$0xf] %v587_v7 }
  0x74   :  { %v769_v57 = vld.sshfl [vmem:[#allocation3] sm:$0x33 pattern:$0x76325410] }
  0x75   :  { %v768_v10 = vld.sshfl [vmem:[#allocation2] sm:$0x33 pattern:$0x76325410]  ;;  %v661_v11 = vcombine.high %v769_v57, %v769_v57  ;;  %v664_v0 = vsel %vm557_vm15, %v769_v57, 0.0 }
  0x76   :  { %v637_v12 = vcombine.high %v768_v10, %v768_v10  ;;  %v640_v13 = vsel %vm557_vm15, %v768_v10, 0.0 }
  0x77   :  { %v665_v21 = vsel %vm557_vm15, %v661_v11, 0.0 }
  0x78   :  { %v641_v18 = vsel %vm557_vm15, %v637_v12, 0.0  ;;  %v666_v15 = vadd.f32 %v665_v21, %v664_v0  ;;  %vm707_vm15 = vcmp.eq.s32.totalorder %v701_v56, 2 }
  0x79   :  { %v642_v22 = vadd.f32 %v641_v18, %v640_v13  ;;  %vm708_vm7 = vmand %vm702_vm1, %vm707_vm15 }
  0x7b   :  { %643 = vadd.xlane.f32.xlu0 %v642_v22 }
  0x7f   :  { %667 = vadd.xlane.f32.xlu0 %v666_v15 }
  0xc2   :  { %v692_v23 = vpop.xlane.xlu1 %691 }
  0xc3   :  { %v693_v48 = vrot.slane %v692_v23, 4 }
  0xc5   :  { %v694_v49 = vadd.f32 %v693_v48, %v692_v23 }
  0xc7   :  { %v695_v5 = vrot.slane %v694_v49, 2 }
  0xc9   :  { %v696_v27 = vadd.f32 %v695_v5, %v694_v49 }
  0xcb   :  { %v697_v40 = vrot.slane %v696_v27, 1 }
  0xcd   :  { %v698_v28 = vadd.f32 %v697_v40, %v696_v27 }
 0x108   :  { %v644_v17 = vpop.xlane.xlu0 %643 }
 0x109   :  { %v645_v20 = vrot.slane %v644_v17, 4 }
 0x10b   :  { %v646_v4 = vadd.f32 %v645_v20, %v644_v17 }
 0x10c   :  { %v668_v6 = vpop.xlane.xlu0 %667 }
 0x10d   :  { %v647_v8 = vrot.slane %v646_v4, 2  ;;  %v669_v9 = vrot.slane %v668_v6, 4 }
 0x10f   :  { %v670_v54 = vadd.f32 %v669_v9, %v668_v6  ;;  %v648_v2 = vadd.f32 %v647_v8, %v646_v4 }
 0x111   :  { %v671_v19 = vrot.slane %v670_v54, 2  ;;  %v649_v33 = vrot.slane %v648_v2, 1 }
 0x113   :  { %v672_v25 = vadd.f32 %v671_v19, %v670_v54  ;;  %v650_v53 = vadd.f32 %v649_v33, %v648_v2 }
 0x115   :  { %771 = vpush %v650_v53  ;;  %v673_v16 = vrot.slane %v672_v25, 1 }
 0x117   :  { %v674_v26 = vadd.f32 %v673_v16, %v672_v25 }
 0x119   :  { %773 = vpush %v674_v26 }
 0x11a   :  { %775 = vpush %v698_v28 }
 0x146   :  { %s772_s2 = spop %771 }
 0x147   :  { %v713_v29 = vstv %s772_s2 }
 0x14a   :  { %s774_s17 = spop %773 }
 0x14b   :  { %v711_v1 = vstv %s774_s17  ;;  %s776_s18 = spop %775 }
 0x14c   :  { %v709_v3 = vstv %s776_s18 }
 0x14d   :  { %v710_v36 = vsel %vm708_vm7, %v709_v3, 0.0 }
 0x14e   :  { %v712_v30 = vsel %vm706_vm8, %v711_v1, %v710_v36 }
 0x14f   :  { %v714_v14 = vsel %vm704_vm9, %v713_v29, %v712_v30 }
 0x150   :  { %715 = vst [vmem:[#allocation5] sm:$0xff] %v714_v14 }
 0x151   :  { %837 = shalt.err (!%p834_p4)
}
 0x152   :  { %s838_s24 = scalar_lea.hbm %s1186_s5, 128 }
 0x153   :  { %p839_p5 = scmp.ne.s32.totalorder %s1186_s5, %s838_s24  ;;  %p842_p6 = scmp.lt.u32.totalorder %s838_s24, %s1186_s5 }
 0x155   :  { %p844_p7 = pnand %p842_p6, %p839_p5 }
 0x157   :  { %847 = shalt.err (!%p844_p7)
}
 0x158   :  { %725 = dma.vmem_to_hbm [thread:$0]  %s723_s20, 128, %s1186_s5, [#allocation6]  }
 0x159   :  { %848 = dma.done.wait [#allocation6], 128  }
 0x15a   :  { %849 = vsyncadd [#allocation6], 4294967168 }
 0x15b   :  { %729 = vsyncpa [#allocation6], 1 }

</bundles_post_ra>
